<compile_context>
chip_gen: v6e
topology: v6e:2x2x1
jax: 0.10.0
libtpu: 0.0.40
codegen_flags: <defaults>
</compile_context>

<pallas_src>
import jax
import jax.numpy as jnp
from jax.experimental import pallas as pl
from jax.experimental.pallas import tpu as pltpu


def _largest_aligned_divisor(dim, max_tile, align):
    """Largest t <= max_tile with dim % t == 0 and t % align == 0; else full dim.

    Returning the full extent is always legal for a BlockSpec (block == array dim).
    """
    if dim <= max_tile:
        return dim
    t = (max_tile // align) * align
    while t >= align:
        if dim % t == 0:
            return t
        t -= align
    return dim


def _sigmoid_kernel(w_ref, mask_ref):
    # w_ref/mask_ref: (1, tf) lane-dense tiles of the flattened weight.
    w = w_ref[...].astype(jnp.float32)
    mask_ref[...] = jax.nn.sigmoid(w).astype(mask_ref.dtype)


def _apply_mask_kernel(mask_ref, x_ref, out_ref):
    # mask_ref: (1, tf); x_ref/out_ref: (tn, tf).
    # Row broadcast of the (1, tf) mask is implicit in jnp broadcasting
    # (no explicit mask[None, ...] materialization).
    out_ref[...] = (x_ref[...].astype(out_ref.dtype)
                    * mask_ref[...].astype(out_ref.dtype))


def det_selection(x, weight, *, max_lane_tile=2048, max_row_tile=256):
    """x: (N, C, H, W), weight: (C, H, W).  Returns (mask, output)."""
    N, C, H, W = x.shape
    assert weight.shape == (C, H, W)
    F = C * H * W

    # Lane-dense 2D views (pure reshapes, no data movement beyond layout).
    x2 = x.reshape(N, F)
    w2 = weight.reshape(1, F)

    # Tile sizes: lanes a multiple of 128 (or full extent), rows a multiple of 8
    # (or full extent).  Blocks stay well under the scoped VMEM limit even when
    # double-buffered (<= 256 * 2048 * 4B = 2 MiB per array block).
    tf = _largest_aligned_divisor(F, max_lane_tile, 128)
    tn = _largest_aligned_divisor(N, max_row_tile, 8)
    n_f = F // tf
    n_n = N // tn

    mask_dtype = weight.dtype                       # matches torch.sigmoid(weight)
    out_dtype = jnp.result_type(x.dtype, mask_dtype)  # matches input.mul(mask)

    # --- Kernel 1: mask = sigmoid(weight), computed once. ---
    mask2 = pl.pallas_call(
        _sigmoid_kernel,
        out_shape=jax.ShapeDtypeStruct((1, F), mask_dtype),
        grid=(n_f,),
        in_specs=[pl.BlockSpec((1, tf), lambda f: (0, f))],
        out_specs=pl.BlockSpec((1, tf), lambda f: (0, f)),
        compiler_params=pltpu.CompilerParams(
            dimension_semantics=("parallel",)),
    )(w2)

    # --- Kernel 2: output = x * mask, streamed over lane-dense tiles. ---
    # Feature-tile axis outer, batch-tile axis inner: the mask block index only
    # depends on the outer axis, so it is not re-fetched across batch steps.
    out2 = pl.pallas_call(
        _apply_mask_kernel,
        out_shape=jax.ShapeDtypeStruct((N, F), out_dtype),
        grid=(n_f, n_n),
        in_specs=[
            pl.BlockSpec((1, tf), lambda f, n: (0, f)),    # mask
            pl.BlockSpec((tn, tf), lambda f, n: (n, f)),   # x
        ],
        out_specs=pl.BlockSpec((tn, tf), lambda f, n: (n, f)),
        compiler_params=pltpu.CompilerParams(
            dimension_semantics=("parallel", "parallel")),
    )(mask2, x2)

    return mask2.reshape(C, H, W), out2.reshape(N, C, H, W)


if __name__ == "__main__":
    # Small shapes consistent with the module: batch=2, channels=4, 16x16 feature map.
    N, C, H, W = 2, 4, 16, 16

    key = jax.random.PRNGKey(0)
    x = jax.random.normal(key, (N, C, H, W), dtype=jnp.float32)

    # Deterministic parameter init, matching reset_parameters(): weight filled with 5.
    weight = jnp.full((C, H, W), 5.0, dtype=jnp.float32)

    mask, out = det_selection(x, weight)
    jax.block_until_ready((mask, out))

    # Reference check (plain JAX)
    mask_ref = jax.nn.sigmoid(weight)
    out_ref = x * mask_ref[None, ...]
    assert mask.shape == (C, H, W) and out.shape == (N, C, H, W)
    assert jnp.allclose(mask, mask_ref, atol=1e-6)
    assert jnp.allclose(out, out_ref, atol=1e-6)

    print("KERNEL_OK")
</pallas_src>

<mosaic_0001>
module attributes {stable_mosaic.version = 11 : i64} {
  func.func @_sigmoid_kernel(%arg0: i32, %arg1: memref<1x1024xf32, #tpu.memory_space<vmem>>, %arg2: memref<1x1024xf32, #tpu.memory_space<vmem>>) attributes {dimension_semantics = [#tpu.dimension_semantics<parallel>], iteration_bounds = array<i64: 1>, scalar_prefetch = 0 : i64, scratch_operands = 0 : i64, tpu.core_type = #tpu.core_type<tc>, window_params = [{transform_indices = @transform_0, window_bounds = array<i64: 1, 1024>}, {transform_indices = @transform_1, window_bounds = array<i64: 1, 1024>}]} {
    %c0 = arith.constant 0 : index
    %c0_0 = arith.constant 0 : index
    %0 = vector.load %arg1[%c0, %c0_0] : memref<1x1024xf32, #tpu.memory_space<vmem>>, vector<1x1024xf32>
    %1 = arith.negf %0 : vector<1x1024xf32>
    %2 = math.exp %1 : vector<1x1024xf32>
    %cst = arith.constant 1.000000e+00 : f32
    %3 = vector.broadcast %cst : f32 to vector<1x1024xf32>
    %4 = arith.addf %3, %2 : vector<1x1024xf32>
    %5 = arith.divf %3, %4 : vector<1x1024xf32>
    %c0_1 = arith.constant 0 : index
    %c0_2 = arith.constant 0 : index
    %6 = vector.load %arg2[%c0_1, %c0_2] : memref<1x1024xf32, #tpu.memory_space<vmem>>, vector<1x1024xf32>
    tpu.vector_store %arg2[%c0_1, %c0_2], %5 {strides = array<i32>} : memref<1x1024xf32, #tpu.memory_space<vmem>>, vector<1x1024xf32>,
    return
  }
  func.func @transform_0(%arg0: i32) -> (i32, i32) {
    %c0_i32 = arith.constant 0 : i32
    %c0_i32_0 = arith.constant 0 : i32
    return %c0_i32, %arg0 : i32, i32
  }
  func.func @transform_1(%arg0: i32) -> (i32, i32) {
    %c0_i32 = arith.constant 0 : i32
    %c0_i32_0 = arith.constant 0 : i32
    return %c0_i32, %arg0 : i32, i32
  }
}

</mosaic_0001>

<bundles_post_ra>
// kernel: tpu_custom_call.1
= control target key start
LH: loop header
LB: loop body
LE: loop exit
PB: predicated region body
PF: predicated region fallthrough
CT: control target
= control target key end

     0   :  { %6 = vsyncpa [#allocation3], 0  ;;  %s113_s0 = inlined_call_operand.hbm [shape: f32[1,1024], index: 0, kind: input, shape index: {}]   ;;  %s114_s1 = inlined_call_operand.hbm [shape: f32[1,1024], index: 1, kind: output, shape index: {}]  }
   0x1   :  { %7 = vsyncpa [#allocation4], 0  ;;  %s95_s6 = smov [#allocation2]  }
   0x2   :  { %s14_s7 = sshll.u32 %s95_s6, 4  ;;  %s15_s7 = int_to_ptr.vmem [resolvable:$true] %s14_s7 }
   0x3   :  { %s59_s8 = scalar_lea.vmem %s15_s7, 128  ;;  %p64_p1 = scmp.lt.s32.totalorder %s15_s7, %s15_s7 }
   0x4   :  { %p60_p0 = scmp.ne.s32.totalorder %s15_s7, %s59_s8  ;;  %p65_p2 = scmp.lt.s32.totalorder %s59_s8, %s59_s8 }
   0x6   :  { %p66_p3 = por %p65_p2, %p64_p1 }
   0x8   :  { %p67_p4 = pnand %p66_p3, %p60_p0 }
   0xa   :  { %70 = shalt.err (!%p67_p4)
}
   0xb   :  { %17 = dma.hbm_to_vmem [thread:$0]  %s113_s0, 128, %s15_s7, [#allocation3]  }
   0xc   :  { %91 = dma.done.wait [#allocation3], 128  }
   0xd   :  { %92 = vsyncadd [#allocation3], 4294967168  ;;  %v21_v0 = vld [vmem:[#allocation2] sm:$0xff]  ;;  %s96_s11 = smov [#allocation5]  }
   0xe   :  { %v44_v1 = vmul.f32 -1.442695, %v21_v0  ;;  %s35_s12 = sshll.u32 %s96_s11, 4  ;;  %s36_s12 = int_to_ptr.vmem [resolvable:$true] %s35_s12 }
   0xf   :  { %s71_s13 = scalar_lea.vmem %s36_s12, 128  ;;  %p76_p6 = scmp.lt.s32.totalorder %s36_s12, %s36_s12 }
  0x10   :  { %47 = vpow2.f32 %v44_v1  ;;  %p72_p5 = scmp.ne.s32.totalorder %s36_s12, %s71_s13  ;;  %p77_p7 = scmp.lt.s32.totalorder %s71_s13, %s71_s13 }
  0x12   :  { %p78_p8 = por %p77_p7, %p76_p6 }
  0x14   :  { %p79_p9 = pnand %p78_p8, %p72_p5 }
  0x1d   :  { %v48_v2 = vpop.eup %47 }
  0x1e   :  { %v25_v3 = vadd.f32 1.0, %v48_v2 }
  0x20   :  { %49 = vrcp.f32 %v25_v3 }
  0x2d   :  { %v50_v4 = vpop.eup %49 }
  0x2e   :  { %28 = vst [vmem:[#allocation5] sm:$0xff] %v50_v4 }
  0x2f   :  { %82 = shalt.err (!%p79_p9)
}
  0x30   :  { %38 = dma.vmem_to_hbm [thread:$0]  %s36_s12, 128, %s114_s1, [#allocation4]  }
  0x31   :  { %93 = dma.done.wait [#allocation4], 128  }
  0x32   :  { %94 = vsyncadd [#allocation4], 4294967168 }
  0x33   :  { %42 = vsyncpa [#allocation3], 1 }
  0x34   :  { %43 = vsyncpa [#allocation4], 1 }

</bundles_post_ra>
